<compile_context>
chip_gen: v5e
topology: v5e:2x2
jax: 0.10.0
libtpu: 0.0.40
codegen_flags: <defaults>
</compile_context>

<pallas_src>
import functools

import jax
import jax.numpy as jnp
from jax.experimental import pallas as pl
from jax.experimental.pallas import tpu as pltpu


# ----------------------------- fused Pallas kernel ---------------------------

def _self_attn_kernel(x_ref, wqkv_ref, wo_ref, mask_ref, pos_ref, o_ref,
                      *, n_heads):
    """One batch element per grid step.

    x_ref    : (1, S, E)      activations
    wqkv_ref : (E, 3P)        fused q/k/v projection weights (resident)
    wo_ref   : (P, E)         output projection weights (resident)
    mask_ref : (1, 1, S, T)   additive attention mask (f32, -1e9 on masked)
    pos_ref  : (1, H, S, T)   T5 relative-position bias (f32)
    o_ref    : (1, S, E)      output
    """
    P = wo_ref.shape[0]
    d = P // n_heads

    # bf16 for the MXU, f32 accumulation everywhere.
    x = x_ref[0].astype(jnp.bfloat16)                         # (S, E)
    wqkv = wqkv_ref[...].astype(jnp.bfloat16)                 # (E, 3P)
    qkv = jnp.dot(x, wqkv, preferred_element_type=jnp.float32)  # (S, 3P) f32
    qkv_bf = qkv.astype(jnp.bfloat16)

    mask = mask_ref[0, 0]                                     # (S, T) f32

    head_outs = []
    for h in range(n_heads):
        sl = slice(h * d, (h + 1) * d)
        qh = qkv_bf[:, sl]                                    # (S, d)
        kh = qkv_bf[:, P + h * d:P + (h + 1) * d]             # (T, d)
        vh = qkv_bf[:, 2 * P + h * d:2 * P + (h + 1) * d]     # (T, d)

        # Unscaled q @ k^T (the d^(1/4) pre-scale cancels SDPA's 1/sqrt(d)),
        # plus mask + per-head position bias, all in f32.
        s = jax.lax.dot_general(qh, kh, (((1,), (1,)), ((), ())),
                                preferred_element_type=jnp.float32)
        s = s + mask + pos_ref[0, h]                          # (S, T) f32

        # Softmax: stats in f32, denominator reciprocal on the EUP.
        m = jnp.max(s, axis=-1, keepdims=True)
        p = jnp.exp(s - m)
        inv = pl.reciprocal(jnp.sum(p, axis=-1, keepdims=True), approx=True)
        oh = jnp.dot(p.astype(jnp.bfloat16), vh,
                     preferred_element_type=jnp.float32) * inv  # (S, d) f32
        head_outs.append(oh)

    attn = jnp.concatenate(head_outs, axis=-1).astype(jnp.bfloat16)  # (S, P)
    out = jnp.dot(attn, wo_ref[...].astype(jnp.bfloat16),
                  preferred_element_type=jnp.float32)                 # (S, E)
    o_ref[0] = out.astype(o_ref.dtype)


# ------------------------------ wrapper ---------------------------------------

def self_attention(x, wq, wk, wv, wo, n_heads, attn_mask, pos_emb,
                   out_dtype=jnp.bfloat16):
    """SelfAttention.forward (eval mode, is_causal, no past_key_value).

    x: (B, S, E); wq/wk/wv: (E, P); wo: (P, E);
    attn_mask: (1, 1, S, S); pos_emb: (1, H, S, S).  Returns (B, S, E).
    """
    B, S, E = x.shape
    P = wq.shape[1]
    T = attn_mask.shape[-1]
    H = n_heads

    # Fuse the three projection weights into one (E, 3P) matmul operand.
    wqkv = jnp.concatenate([wq, wk, wv], axis=1)

    kernel = functools.partial(_self_attn_kernel, n_heads=H)

    # TODO(synk): for long sequences (v7x 64 MiB VMEM) add a KV grid axis with
    # an online/flash softmax instead of materialising the (S, T) scores.
    return pl.pallas_call(
        kernel,
        grid=(B,),
        in_specs=[
            pl.BlockSpec((1, S, E), lambda b: (b, 0, 0)),       # x
            pl.BlockSpec((E, 3 * P), lambda b: (0, 0)),         # wqkv (resident)
            pl.BlockSpec((P, E), lambda b: (0, 0)),             # wo   (resident)
            pl.BlockSpec((1, 1, S, T), lambda b: (0, 0, 0, 0)),  # attn_mask
            pl.BlockSpec((1, H, S, T), lambda b: (0, 0, 0, 0)),  # pos_embeddings
        ],
        out_specs=pl.BlockSpec((1, S, E), lambda b: (b, 0, 0)),
        out_shape=jax.ShapeDtypeStruct((B, S, E), out_dtype),
        compiler_params=pltpu.CompilerParams(
            dimension_semantics=("parallel",)),
    )(x, wqkv, wo, attn_mask.astype(jnp.float32), pos_emb.astype(jnp.float32))


# ------------------------------ pure-JAX reference ---------------------------

def ref_self_attention(x, wq, wk, wv, wo, n_heads, attn_mask, pos_emb):
    B, S, E = x.shape
    P = wq.shape[1]
    d = P // n_heads

    def heads(h):
        return h.reshape(B, S, n_heads, d).transpose(0, 2, 1, 3)

    q, k, v = heads(x @ wq), heads(x @ wk), heads(x @ wv)
    s = jnp.einsum("bhqd,bhkd->bhqk", q, k) + attn_mask + pos_emb
    p = jax.nn.softmax(s, axis=-1)
    o = jnp.einsum("bhqk,bhkd->bhqd", p, v)
    o = o.transpose(0, 2, 1, 3).reshape(B, S, P)
    return o @ wo


# ------------------------------ main ------------------------------------------

if __name__ == "__main__":
    B, S, E, P, H = 2, 8, 32, 32, 4   # head dim d = P // H = 8

    key = jax.random.PRNGKey(0)
    ks = jax.random.split(key, 8)

    def w(k_, shape):
        return jax.random.normal(k_, shape, jnp.float32) * 0.02

    wq, wk, wv = w(ks[0], (E, P)), w(ks[1], (E, P)), w(ks[2], (E, P))
    wo = w(ks[3], (P, E))
    x = jax.random.normal(ks[4], (B, S, E), jnp.float32)
    pos_emb = jax.random.normal(ks[5], (1, H, S, S), jnp.float32) * 0.1
    causal = jnp.where(jnp.tril(jnp.ones((S, S), dtype=bool)), 0.0, -1e9)
    attn_mask = causal[None, None].astype(jnp.float32)        # (1, 1, S, S)

    out = self_attention(x, wq, wk, wv, wo, H, attn_mask, pos_emb)
    out = jax.block_until_ready(out)

    ref = ref_self_attention(x, wq, wk, wv, wo, H, attn_mask, pos_emb)
    assert out.shape == (B, S, E)
    err = float(jnp.max(jnp.abs(out.astype(jnp.float32) - ref)))
    # bf16 matmuls + approx reciprocal => loosened tolerance vs the f32 reference.
    assert err < 2e-2, err

    # TODO(synk): dropout is identity at inference (p=0); past_key_value /
    # return_past_kv KV-cache path not implemented.
    print("KERNEL_OK")
</pallas_src>

<mosaic_0001>
module attributes {stable_mosaic.version = 11 : i64} {
  func.func @_self_attn_kernel(%arg0: i32, %arg1: memref<1x8x32xf32, #tpu.memory_space<vmem>>, %arg2: memref<32x96xf32, #tpu.memory_space<vmem>>, %arg3: memref<32x32xf32, #tpu.memory_space<vmem>>, %arg4: memref<1x1x8x8xf32, #tpu.memory_space<vmem>>, %arg5: memref<1x4x8x8xf32, #tpu.memory_space<vmem>>, %arg6: memref<1x8x32xbf16, #tpu.memory_space<vmem>>) attributes {dimension_semantics = [#tpu.dimension_semantics<parallel>], iteration_bounds = array<i64: 2>, scalar_prefetch = 0 : i64, scratch_operands = 0 : i64, tpu.core_type = #tpu.core_type<tc>, window_params = [{transform_indices = @transform_0, window_bounds = array<i64: 1, 8, 32>}, {pipeline_mode = #tpu.pipeline_mode<synchronous>, transform_indices = @transform_1, window_bounds = array<i64: 32, 96>}, {pipeline_mode = #tpu.pipeline_mode<synchronous>, transform_indices = @transform_2, window_bounds = array<i64: 32, 32>}, {pipeline_mode = #tpu.pipeline_mode<synchronous>, transform_indices = @transform_3, window_bounds = array<i64: 1, 1, 8, 8>}, {pipeline_mode = #tpu.pipeline_mode<synchronous>, transform_indices = @transform_4, window_bounds = array<i64: 1, 4, 8, 8>}, {transform_indices = @transform_5, window_bounds = array<i64: 1, 8, 32>}]} {
    %c0 = arith.constant 0 : index
    %c0_0 = arith.constant 0 : index
    %c0_1 = arith.constant 0 : index
    %0 = vector.load %arg1[%c0, %c0_0, %c0_1] : memref<1x8x32xf32, #tpu.memory_space<vmem>>, vector<1x8x32xf32>
    %1 = vector.shape_cast %0 : vector<1x8x32xf32> to vector<8x32xf32>
    %2 = arith.truncf %1 : vector<8x32xf32> to vector<8x32xbf16>
    %c0_2 = arith.constant 0 : index
    %c0_3 = arith.constant 0 : index
    %3 = vector.load %arg2[%c0_2, %c0_3] : memref<32x96xf32, #tpu.memory_space<vmem>>, vector<32x96xf32>
    %4 = arith.truncf %3 : vector<32x96xf32> to vector<32x96xbf16>
    %cst = arith.constant dense<0.000000e+00> : vector<8x96xf32>
    %5 = tpu.matmul %2, %4, %cst {dimension_numbers = #tpu.dot_dimension_numbers<[1], [0], [0], [1], [0, 0, 1, 1], [], []>} : vector<8x32xbf16>, vector<32x96xbf16>, vector<8x96xf32> -> vector<8x96xf32>
    %6 = arith.truncf %5 : vector<8x96xf32> to vector<8x96xbf16>
    %c0_4 = arith.constant 0 : index
    %c0_5 = arith.constant 0 : index
    %c0_6 = arith.constant 0 : index
    %c0_7 = arith.constant 0 : index
    %7 = vector.load %arg4[%c0_4, %c0_5, %c0_6, %c0_7] : memref<1x1x8x8xf32, #tpu.memory_space<vmem>>, vector<1x1x8x8xf32>
    %8 = vector.shape_cast %7 : vector<1x1x8x8xf32> to vector<8x8xf32>
    %9 = vector.extract_strided_slice %6 {offsets = [0, 0], sizes = [8, 8], strides = [1, 1]} : vector<8x96xbf16> to vector<8x8xbf16>
    %10 = vector.extract_strided_slice %6 {offsets = [0, 32], sizes = [8, 8], strides = [1, 1]} : vector<8x96xbf16> to vector<8x8xbf16>
    %11 = vector.extract_strided_slice %6 {offsets = [0, 64], sizes = [8, 8], strides = [1, 1]} : vector<8x96xbf16> to vector<8x8xbf16>
    %cst_8 = arith.constant dense<0.000000e+00> : vector<8x8xf32>
    %12 = tpu.matmul %9, %10, %cst_8 {dimension_numbers = #tpu.dot_dimension_numbers<[1], [1], [0], [0], [0, 0, 1, 0], [], []>} : vector<8x8xbf16>, vector<8x8xbf16>, vector<8x8xf32> -> vector<8x8xf32>
    %13 = arith.addf %12, %8 : vector<8x8xf32>
    %c0_9 = arith.constant 0 : index
    %c0_10 = arith.constant 0 : index
    %c0_11 = arith.constant 0 : index
    %c0_12 = arith.constant 0 : index
    %14 = vector.load %arg5[%c0_9, %c0_10, %c0_11, %c0_12] : memref<1x4x8x8xf32, #tpu.memory_space<vmem>>, vector<1x1x8x8xf32>
    %15 = vector.shape_cast %14 : vector<1x1x8x8xf32> to vector<8x8xf32>
    %16 = arith.addf %13, %15 : vector<8x8xf32>
    %cst_13 = arith.constant dense<0xFF800000> : vector<8xf32>
    %17 = vector.multi_reduction <maximumf>, %16, %cst_13 [1] : vector<8x8xf32> to vector<8xf32>
    %18 = vector.shape_cast %17 : vector<8xf32> to vector<8x1xf32>
    %19 = vector.broadcast %18 : vector<8x1xf32> to vector<8x8xf32>
    %20 = arith.subf %16, %19 : vector<8x8xf32>
    %21 = math.exp %20 : vector<8x8xf32>
    %cst_14 = arith.constant dense<0.000000e+00> : vector<8xf32>
    %22 = vector.multi_reduction <add>, %21, %cst_14 [1] : vector<8x8xf32> to vector<8xf32>
    %23 = vector.shape_cast %22 : vector<8xf32> to vector<8x1xf32>
    %24 = tpu.reciprocal %23 {approx = true} : vector<8x1xf32> -> vector<8x1xf32>
    %25 = arith.truncf %21 : vector<8x8xf32> to vector<8x8xbf16>
    %cst_15 = arith.constant dense<0.000000e+00> : vector<8x8xf32>
    %26 = tpu.matmul %25, %11, %cst_15 {dimension_numbers = #tpu.dot_dimension_numbers<[1], [0], [0], [1], [0, 0, 1, 1], [], []>} : vector<8x8xbf16>, vector<8x8xbf16>, vector<8x8xf32> -> vector<8x8xf32>
    %27 = vector.broadcast %24 : vector<8x1xf32> to vector<8x8xf32>
    %28 = arith.mulf %26, %27 : vector<8x8xf32>
    %29 = vector.extract_strided_slice %6 {offsets = [0, 8], sizes = [8, 8], strides = [1, 1]} : vector<8x96xbf16> to vector<8x8xbf16>
    %30 = vector.extract_strided_slice %6 {offsets = [0, 40], sizes = [8, 8], strides = [1, 1]} : vector<8x96xbf16> to vector<8x8xbf16>
    %31 = vector.extract_strided_slice %6 {offsets = [0, 72], sizes = [8, 8], strides = [1, 1]} : vector<8x96xbf16> to vector<8x8xbf16>
    %cst_16 = arith.constant dense<0.000000e+00> : vector<8x8xf32>
    %32 = tpu.matmul %29, %30, %cst_16 {dimension_numbers = #tpu.dot_dimension_numbers<[1], [1], [0], [0], [0, 0, 1, 0], [], []>} : vector<8x8xbf16>, vector<8x8xbf16>, vector<8x8xf32> -> vector<8x8xf32>
    %33 = arith.addf %32, %8 : vector<8x8xf32>
    %c0_17 = arith.constant 0 : index
    %c1 = arith.constant 1 : index
    %c0_18 = arith.constant 0 : index
    %c0_19 = arith.constant 0 : index
    %34 = vector.load %arg5[%c0_17, %c1, %c0_18, %c0_19] : memref<1x4x8x8xf32, #tpu.memory_space<vmem>>, vector<1x1x8x8xf32>
    %35 = vector.shape_cast %34 : vector<1x1x8x8xf32> to vector<8x8xf32>
    %36 = arith.addf %33, %35 : vector<8x8xf32>
    %cst_20 = arith.constant dense<0xFF800000> : vector<8xf32>
    %37 = vector.multi_reduction <maximumf>, %36, %cst_20 [1] : vector<8x8xf32> to vector<8xf32>
    %38 = vector.shape_cast %37 : vector<8xf32> to vector<8x1xf32>
    %39 = vector.broadcast %38 : vector<8x1xf32> to vector<8x8xf32>
    %40 = arith.subf %36, %39 : vector<8x8xf32>
    %41 = math.exp %40 : vector<8x8xf32>
    %cst_21 = arith.constant dense<0.000000e+00> : vector<8xf32>
    %42 = vector.multi_reduction <add>, %41, %cst_21 [1] : vector<8x8xf32> to vector<8xf32>
    %43 = vector.shape_cast %42 : vector<8xf32> to vector<8x1xf32>
    %44 = tpu.reciprocal %43 {approx = true} : vector<8x1xf32> -> vector<8x1xf32>
    %45 = arith.truncf %41 : vector<8x8xf32> to vector<8x8xbf16>
    %cst_22 = arith.constant dense<0.000000e+00> : vector<8x8xf32>
    %46 = tpu.matmul %45, %31, %cst_22 {dimension_numbers = #tpu.dot_dimension_numbers<[1], [0], [0], [1], [0, 0, 1, 1], [], []>} : vector<8x8xbf16>, vector<8x8xbf16>, vector<8x8xf32> -> vector<8x8xf32>
    %47 = vector.broadcast %44 : vector<8x1xf32> to vector<8x8xf32>
    %48 = arith.mulf %46, %47 : vector<8x8xf32>
    %49 = vector.extract_strided_slice %6 {offsets = [0, 16], sizes = [8, 8], strides = [1, 1]} : vector<8x96xbf16> to vector<8x8xbf16>
    %50 = vector.extract_strided_slice %6 {offsets = [0, 48], sizes = [8, 8], strides = [1, 1]} : vector<8x96xbf16> to vector<8x8xbf16>
    %51 = vector.extract_strided_slice %6 {offsets = [0, 80], sizes = [8, 8], strides = [1, 1]} : vector<8x96xbf16> to vector<8x8xbf16>
    %cst_23 = arith.constant dense<0.000000e+00> : vector<8x8xf32>
    %52 = tpu.matmul %49, %50, %cst_23 {dimension_numbers = #tpu.dot_dimension_numbers<[1], [1], [0], [0], [0, 0, 1, 0], [], []>} : vector<8x8xbf16>, vector<8x8xbf16>, vector<8x8xf32> -> vector<8x8xf32>
    %53 = arith.addf %52, %8 : vector<8x8xf32>
    %c0_24 = arith.constant 0 : index
    %c2 = arith.constant 2 : index
    %c0_25 = arith.constant 0 : index
    %c0_26 = arith.constant 0 : index
    %54 = vector.load %arg5[%c0_24, %c2, %c0_25, %c0_26] : memref<1x4x8x8xf32, #tpu.memory_space<vmem>>, vector<1x1x8x8xf32>
    %55 = vector.shape_cast %54 : vector<1x1x8x8xf32> to vector<8x8xf32>
    %56 = arith.addf %53, %55 : vector<8x8xf32>
    %cst_27 = arith.constant dense<0xFF800000> : vector<8xf32>
    %57 = vector.multi_reduction <maximumf>, %56, %cst_27 [1] : vector<8x8xf32> to vector<8xf32>
    %58 = vector.shape_cast %57 : vector<8xf32> to vector<8x1xf32>
    %59 = vector.broadcast %58 : vector<8x1xf32> to vector<8x8xf32>
    %60 = arith.subf %56, %59 : vector<8x8xf32>
    %61 = math.exp %60 : vector<8x8xf32>
    %cst_28 = arith.constant dense<0.000000e+00> : vector<8xf32>
    %62 = vector.multi_reduction <add>, %61, %cst_28 [1] : vector<8x8xf32> to vector<8xf32>
    %63 = vector.shape_cast %62 : vector<8xf32> to vector<8x1xf32>
    %64 = tpu.reciprocal %63 {approx = true} : vector<8x1xf32> -> vector<8x1xf32>
    %65 = arith.truncf %61 : vector<8x8xf32> to vector<8x8xbf16>
    %cst_29 = arith.constant dense<0.000000e+00> : vector<8x8xf32>
    %66 = tpu.matmul %65, %51, %cst_29 {dimension_numbers = #tpu.dot_dimension_numbers<[1], [0], [0], [1], [0, 0, 1, 1], [], []>} : vector<8x8xbf16>, vector<8x8xbf16>, vector<8x8xf32> -> vector<8x8xf32>
    %67 = vector.broadcast %64 : vector<8x1xf32> to vector<8x8xf32>
    %68 = arith.mulf %66, %67 : vector<8x8xf32>
    %69 = vector.extract_strided_slice %6 {offsets = [0, 24], sizes = [8, 8], strides = [1, 1]} : vector<8x96xbf16> to vector<8x8xbf16>
    %70 = vector.extract_strided_slice %6 {offsets = [0, 56], sizes = [8, 8], strides = [1, 1]} : vector<8x96xbf16> to vector<8x8xbf16>
    %71 = vector.extract_strided_slice %6 {offsets = [0, 88], sizes = [8, 8], strides = [1, 1]} : vector<8x96xbf16> to vector<8x8xbf16>
    %cst_30 = arith.constant dense<0.000000e+00> : vector<8x8xf32>
    %72 = tpu.matmul %69, %70, %cst_30 {dimension_numbers = #tpu.dot_dimension_numbers<[1], [1], [0], [0], [0, 0, 1, 0], [], []>} : vector<8x8xbf16>, vector<8x8xbf16>, vector<8x8xf32> -> vector<8x8xf32>
    %73 = arith.addf %72, %8 : vector<8x8xf32>
    %c0_31 = arith.constant 0 : index
    %c3 = arith.constant 3 : index
    %c0_32 = arith.constant 0 : index
    %c0_33 = arith.constant 0 : index
    %74 = vector.load %arg5[%c0_31, %c3, %c0_32, %c0_33] : memref<1x4x8x8xf32, #tpu.memory_space<vmem>>, vector<1x1x8x8xf32>
    %75 = vector.shape_cast %74 : vector<1x1x8x8xf32> to vector<8x8xf32>
    %76 = arith.addf %73, %75 : vector<8x8xf32>
    %cst_34 = arith.constant dense<0xFF800000> : vector<8xf32>
    %77 = vector.multi_reduction <maximumf>, %76, %cst_34 [1] : vector<8x8xf32> to vector<8xf32>
    %78 = vector.shape_cast %77 : vector<8xf32> to vector<8x1xf32>
    %79 = vector.broadcast %78 : vector<8x1xf32> to vector<8x8xf32>
    %80 = arith.subf %76, %79 : vector<8x8xf32>
    %81 = math.exp %80 : vector<8x8xf32>
    %cst_35 = arith.constant dense<0.000000e+00> : vector<8xf32>
    %82 = vector.multi_reduction <add>, %81, %cst_35 [1] : vector<8x8xf32> to vector<8xf32>
    %83 = vector.shape_cast %82 : vector<8xf32> to vector<8x1xf32>
    %84 = tpu.reciprocal %83 {approx = true} : vector<8x1xf32> -> vector<8x1xf32>
    %85 = arith.truncf %81 : vector<8x8xf32> to vector<8x8xbf16>
    %cst_36 = arith.constant dense<0.000000e+00> : vector<8x8xf32>
    %86 = tpu.matmul %85, %71, %cst_36 {dimension_numbers = #tpu.dot_dimension_numbers<[1], [0], [0], [1], [0, 0, 1, 1], [], []>} : vector<8x8xbf16>, vector<8x8xbf16>, vector<8x8xf32> -> vector<8x8xf32>
    %87 = vector.broadcast %84 : vector<8x1xf32> to vector<8x8xf32>
    %88 = arith.mulf %86, %87 : vector<8x8xf32>
    %89 = tpu.concatenate %28, %48, %68, %88 in 1 : vector<8x8xf32>, vector<8x8xf32>, vector<8x8xf32>, vector<8x8xf32> -> vector<8x32xf32>
    %90 = arith.truncf %89 : vector<8x32xf32> to vector<8x32xbf16>
    %c0_37 = arith.constant 0 : index
    %c0_38 = arith.constant 0 : index
    %91 = vector.load %arg3[%c0_37, %c0_38] : memref<32x32xf32, #tpu.memory_space<vmem>>, vector<32x32xf32>
    %92 = arith.truncf %91 : vector<32x32xf32> to vector<32x32xbf16>
    %cst_39 = arith.constant dense<0.000000e+00> : vector<8x32xf32>
    %93 = tpu.matmul %90, %92, %cst_39 {dimension_numbers = #tpu.dot_dimension_numbers<[1], [0], [0], [1], [0, 0, 1, 1], [], []>} : vector<8x32xbf16>, vector<32x32xbf16>, vector<8x32xf32> -> vector<8x32xf32>
    %94 = arith.truncf %93 : vector<8x32xf32> to vector<8x32xbf16>
    %c0_40 = arith.constant 0 : index
    %c0_41 = arith.constant 0 : index
    %c0_42 = arith.constant 0 : index
    %95 = vector.load %arg6[%c0_40, %c0_41, %c0_42] : memref<1x8x32xbf16, #tpu.memory_space<vmem>>, vector<1x8x32xbf16>
    %96 = vector.shape_cast %95 : vector<1x8x32xbf16> to vector<8x32xbf16>
    %97 = vector.shape_cast %94 : vector<8x32xbf16> to vector<1x8x32xbf16>
    tpu.vector_store %arg6[%c0_40, %c0_41, %c0_42], %97 {strides = array<i32>} : memref<1x8x32xbf16, #tpu.memory_space<vmem>>, vector<1x8x32xbf16>,
    return
  }
  func.func @transform_0(%arg0: i32) -> (i32, i32, i32) {
    %c0_i32 = arith.constant 0 : i32
    %c0_i32_0 = arith.constant 0 : i32
    %c0_i32_1 = arith.constant 0 : i32
    return %arg0, %c0_i32, %c0_i32_0 : i32, i32, i32
  }
  func.func @transform_1(%arg0: i32) -> (i32, i32) {
    %c0_i32 = arith.constant 0 : i32
    %c0_i32_0 = arith.constant 0 : i32
    %c0_i32_1 = arith.constant 0 : i32
    return %c0_i32, %c0_i32_0 : i32, i32
  }
  func.func @transform_2(%arg0: i32) -> (i32, i32) {
    %c0_i32 = arith.constant 0 : i32
    %c0_i32_0 = arith.constant 0 : i32
    %c0_i32_1 = arith.constant 0 : i32
    return %c0_i32, %c0_i32_0 : i32, i32
  }
  func.func @transform_3(%arg0: i32) -> (i32, i32, i32, i32) {
    %c0_i32 = arith.constant 0 : i32
    %c0_i32_0 = arith.constant 0 : i32
    %c0_i32_1 = arith.constant 0 : i32
    %c0_i32_2 = arith.constant 0 : i32
    %c0_i32_3 = arith.constant 0 : i32
    return %c0_i32, %c0_i32_0, %c0_i32_1, %c0_i32_2 : i32, i32, i32, i32
  }
  func.func @transform_4(%arg0: i32) -> (i32, i32, i32, i32) {
    %c0_i32 = arith.constant 0 : i32
    %c0_i32_0 = arith.constant 0 : i32
    %c0_i32_1 = arith.constant 0 : i32
    %c0_i32_2 = arith.constant 0 : i32
    %c0_i32_3 = arith.constant 0 : i32
    return %c0_i32, %c0_i32_0, %c0_i32_1, %c0_i32_2 : i32, i32, i32, i32
  }
  func.func @transform_5(%arg0: i32) -> (i32, i32, i32) {
    %c0_i32 = arith.constant 0 : i32
    %c0_i32_0 = arith.constant 0 : i32
    %c0_i32_1 = arith.constant 0 : i32
    return %arg0, %c0_i32, %c0_i32_0 : i32, i32, i32
  }
}

</mosaic_0001>

<bundles_post_ra>
// kernel: tpu_custom_call.1
= control target key start
LH: loop header
LB: loop body
LE: loop exit
PB: predicated region body
PF: predicated region fallthrough
CT: control target
= control target key end

     0   :  { %10 = vsyncpa [#allocation3], 0  ;;  %s1372_s0 = inlined_call_operand.hbm [shape: f32[2,8,32], index: 0, kind: input, shape index: {}]   ;;  %s1373_s1 = inlined_call_operand.hbm [shape: f32[32,96], index: 1, kind: input, shape index: {}]   ;;  %s1374_s2 = inlined_call_operand.hbm [shape: f32[32,32], index: 2, kind: input, shape index: {}]   ;;  %s1375_s3 = inlined_call_operand.hbm [shape: f32[1,1,8,8], index: 3, kind: input, shape index: {}]   ;;  %s1376_s4 = inlined_call_operand.hbm [shape: f32[1,4,8,8], index: 4, kind: input, shape index: {}]   ;;  %s1377_s5 = inlined_call_operand.hbm [shape: bf16[2,8,32], index: 5, kind: output, shape index: {}]  }
   0x1   :  { %12 = vsyncpa [#allocation3 + $0x1], 0 }
   0x2   :  { %13 = vsyncpa [#allocation6], 0 }
   0x3   :  { %14 = vsyncpa [#allocation9], 0 }
   0x4   :  { %15 = vsyncpa [#allocation4], 0 }
   0x5   :  { %17 = vsyncpa [#allocation4 + $0x1], 0  ;;  %s1164_s18 = smov 0   ;;  %s1166_s19 = smov 0  }
   0x6   :  { %s1168_s20 = smov 0   ;;  %s1170_s21 = smov 0  }
   0x7 LB: > { %s175_s24 = sshll.u32 %s1373_s1, 4  ;;  %s1188_s25 = sadd.s32 4294967295, %s1112_s21   ;;  %s1112_s21 = sphi %s1170_s21, %s1389_s21   ;;  %s1108_s20 = sphi %s1168_s20, %s1388_s20   ;;  %s1104_s19 = sphi %s1166_s19, %s1387_s19   ;;  %s1100_s18 = sphi %s1164_s18, %s1386_s18   ;;  %s176_s24 = int_to_ptr.hbm [resolvable:$true] %s175_s24 }
   0x8   : > { %p740_p0 = scmp.ge.s32.totalorder %s1112_s21, 1  ;;  %p44_p1 = scmp.eq.s32.totalorder %s1188_s25, 0 }
   0x9   : > { %p164_p2 = scmp.lt.s32.totalorder %s1112_s21, 3  ;;  %s1114_s27 = smov [#allocation5]  }
   0xa   : > { %s177_s28 = sshll.u32 %s1114_s27, 4  ;;  %s204_s6 = sshll.u32 %s1375_s3, 4  ;;  %s178_s28 = int_to_ptr.vmem [resolvable:$true] %s177_s28  ;;  %s205_s6 = int_to_ptr.hbm [resolvable:$true] %s204_s6 }
   0xb   : > { %p1193_p3 = pnand %p740_p0, %p164_p2  ;;  %s189_s10 = sshll.u32 %s1374_s2, 4  ;;  %s190_s10 = int_to_ptr.hbm [resolvable:$true] %s189_s10 }
   0xc   : > { %s1115_s11 = smov [#allocation8]   ;;  %s1116_s13 = smov 128  }
   0xd   : > { %p789_p4 = pneg %p1193_p3  ;;  %s206_s12 = sshll.u32 %s1115_s11, 4  ;;  %s207_s12 = int_to_ptr.vmem [resolvable:$true] %s206_s12 }
   0xe   : > { %s1117_s14 = smov 8   ;;  %s215_s17 = sshll.u32 %s1376_s4, 4  ;;  %s216_s17 = int_to_ptr.hbm [resolvable:$true] %s215_s17 }
   0xf   : > { %p1205_p6 = pnand %p789_p4, %p44_p1  ;;  %s1118_s22 = smov [#allocation7]  }
  0x10   : > { %s191_s23 = sshll.u32 %s1118_s22, 4  ;;  %s1225_s29 = sadd.s32 1, %s1112_s21   ;;  %s192_s23 = int_to_ptr.vmem [resolvable:$true] %s191_s23 }
  0x11   : > { %792 = dma.hbm_to_vmem [thread:$0]  (!%p1205_p6), %s176_s24, 512, %s178_s28, [#allocation6], %s1116_s13, %s1116_s13, %s1117_s14  }
  0x12   : > { %798 = dma.hbm_to_vmem [thread:$0]  (!%p1205_p6), %s205_s6, 128, %s207_s12, [#allocation9]  }
  0x13   : > { %795 = dma.hbm_to_vmem [thread:$0]  (!%p1205_p6), %s190_s10, 512, %s192_s23, [#allocation6], %s1116_s13, %s1116_s13, %s1117_s14  }
  0x14   : > { %s1119_s24 = smov [#allocation10]   ;;  %s739_s28 = sadd.s32 4294967294, %s1112_s21  }
  0x15   : > { %s217_s27 = sshll.u32 %s1119_s24, 4  ;;  %s27_s30 = ssub.s32 %s1112_s21, %s1225_s29  ;;  %s218_s27 = int_to_ptr.vmem [resolvable:$true] %s217_s27 }
  0x16   : > { %801 = dma.hbm_to_vmem [thread:$0]  (!%p1205_p6), %s216_s17, 512, %s218_s27, [#allocation9], %s1116_s13, %s1116_s13, %s1117_s14  }
  0x17   : > { %s30_s6 = sadd.s32 1, %s1108_s20  ;;  %p28_p7 = scmp.eq.s32.totalorder %s27_s30, 0 }
  0x18   : > { %p37_p8 = scmp.ne.s32.totalorder %s1108_s20, %s1104_s19  ;;  %p38_p9 = scmp.eq.s32.totalorder %s1112_s21, 0 }
  0x19   : > { %p43_p10 = scmp.ne.s32.totalorder %s1104_s19, %s1100_s18  ;;  %p151_p13 = scmp.eq.s32.totalorder %s1188_s25, 1 }
  0x1a   : > { %s1236_s8 = scalar_select %p28_p7, %s1108_s20, %s30_s6  }
  0x1b   : > { %p1238_p11 = por %p38_p9, %p37_p8  ;;  %p1244_p12 = por %p44_p1, %p43_p10 }
  0x1c   : > { %p157_p0 = scmp.eq.s32.totalorder %s739_s28, 1  ;;  %p814_p2 = scmp.lt.s32.totalorder %s1112_s21, 2 }
  0x1d   : > { %s231_s10 = sand.u32 1, %s1108_s20   ;;  %p1251_p4 = por %p151_p13, %p37_p8 }
  0x1e   : > { %p1255_p6 = por %p157_p0, %p43_p10  ;;  %s746_s13 = sshll.u32 %s231_s10, 3 }
  0x1f   : > { %s747_s14 = sshll.u32 %s1112_s21, 3  ;;  %s235_s22 = scalar_lea.vmem [#allocation2], %s746_s13 }
  0x20   : > { %s239_s17 = scalar_lea.hbm %s1372_s0, %s747_s14  ;;  %s243_s23 = sshll.u32 %s235_s22, 4  ;;  %s244_s23 = int_to_ptr.vmem [resolvable:$true] %s243_s23 }
  0x21   : > { %s241_s24 = sshll.u32 %s239_s17, 4  ;;  %p1265_p7 = pnand %p814_p2, %p1238_p11  ;;  %s242_s24 = int_to_ptr.hbm [resolvable:$true] %s241_s24 }
  0x22   : > { %s232_s28 = scalar_lea.sflag [#allocation3], %s231_s10  ;;  %s1008_s30 = sshra.s32 %s242_s24, 4  ;;  %s1009_s30 = int_to_ptr.hbm [resolvable:$true] %s1008_s30 }
  0x23   : > { %s1010_s6 = scalar_lea.hbm %s1009_s30, 8  ;;  %p1012_p9 = pneg %p1265_p7 }
  0x24   : > { %p1011_p8 = scmp.ne.s32.totalorder %s1009_s30, %s1010_s6  ;;  %s1015_s15 = scalar_lea.hbm %s1372_s0, 16 }
  0x25   : > { %p1016_p11 = scmp.lt.s32.totalorder %s1009_s30, %s1372_s0  ;;  %p1017_p0 = scmp.lt.s32.totalorder %s1015_s15, %s1010_s6 }
  0x26   : > { %p1013_p10 = pnand %p1012_p9, %p1011_p8 }
  0x27   : > { %p1018_p2 = por %p1017_p0, %p1016_p11 }
  0x28   : > { %p1014_p13 = pneg %p1013_p10 }
  0x2a   : > { %p1019_p5 = pnand %p1018_p2, %p1014_p13 }
  0x2c   : > { %1022 = shalt.err (!%p1019_p5)
}
  0x2d   : > { %805 = dma.hbm_to_vmem [thread:$0]  (!%p1265_p7), %s242_s24, 128, %s244_s23, %s232_s28  }
  0x2e   : > { %252 = sbr.rel (%p1193_p3) target bundleno = 1000 (0x3e8), region = 40  ;;  %s1282_s10 = sand.u32 (!%p1193_p3), 1, %s1104_s19  }
  0x2f   : > { %s749_s17 = sshll.u32 (!%p1193_p3), %s1282_s10, 3  ;;  %s255_s22 = scalar_lea.sflag (!%p1193_p3), [#allocation3], %s1282_s10 }
  0x30   : > { %s258_s13 = scalar_lea.vmem (!%p1193_p3), [#allocation2], %s749_s17 }
  0x33   : > { %1083 = dma.done.wait (%p1244_p12), %s255_s22, 128  }
  0x34   : > { %1085 = vsyncadd (%p1244_p12), %s255_s22, 4294967168 }
  0x35   : > { %1087 = dma.done.wait (%p44_p1), [#allocation6], 1024  }
  0x36   : > { %1089 = vsyncadd (%p44_p1), [#allocation6], 4294966272 }
  0x37   : > { %1091 = dma.done.wait (%p44_p1), [#allocation9], 640  }
  0x38   : > { %1093 = vsyncadd (%p44_p1), [#allocation9], 4294966656  ;;  %v311_v0 = vld [vmem:[#allocation5 + $0x10] sm:$0xff]  ;;  %v312_v1 = vld [vmem:[#allocation5 + $0x18] sm:$0xff]  ;;  %vm315_vm0 = vcmask 261120   ;;  %s1120_s26 = smov 104  }
  0x39   : > { %v309_v2 = vld [vmem:[#allocation5] sm:$0xff]  ;;  %v314_v3 = vpack.c.bf16 %v312_v1, %v311_v0  ;;  %v310_v4 = vld [vmem:[#allocation5 + $0x8] sm:$0xff]  ;;  %v307_v6 = vld [vmem:[%s258_s13] sm:$0xff]  ;;  %s1121_s7 = smov 120   ;;  %s1122_s23 = smov 96   ;;  %vm339_vm1 = vcmask 64512  }
  0x3a   : > { %v313_v5 = vpack.c.bf16 %v310_v4, %v309_v2  ;;  %v308_v7 = vpack.c.bf16 %v307_v6, %v307_v6  ;;  %s1123_s24 = smov 80   ;;  %s1124_s27 = smov 72   ;;  %vm377_vm2 = vcmask 1043456   ;;  %v333_v28 = vld [vmem:[#allocation8] sm:$0xff]  ;;  %v359_v30 = vld [vmem:[#allocation10] sm:$0xff]  ;;  %v478_v36 = vld [vmem:[#allocation10 + $0x10] sm:$0xff] }
  0x3b   : > { %325 = vmatpush.bf16.msra.mxu0 %v314_v3  ;;  %s1125_s28 = smov 88   ;;  %s1126_s30 = smov 64   ;;  %v419_v41 = vld [vmem:[#allocation10 + $0x8] sm:$0xff]  ;;  %v537_v48 = vld [vmem:[#allocation10 + $0x18] sm:$0xff]  ;;  %vm585_vm3 = vcmask 130048   ;;  %vm587_vm4 = vcmask 195584  }
  0x3c   : > { %s1127_s6 = smov 112   ;;  %s1128_s14 = smov 56   ;;  %vm613_vm5 = vcmask 257024  }
  0x3d   : > { %s1129_s15 = smov 48   ;;  %s1130_s16 = smov 40  }
  0x3e   : > { %s1131_s9 = smov 8   ;;  %s1132_s17 = smov 16  }
  0x3f   : > { %326 = vmatpush.bf16.msra.mxu0 %v313_v5  ;;  %s1133_s22 = smov 24   ;;  %s766_s13 = sshll.u32 %s1188_s25, 2 }
  0x42   : > { %755 = vmatmul.msk.bf16.vlgmr.msra.gmra.mxu0 %vm315_vm0, %v308_v7 }
  0xbf   : > { %v328_v8 = vpop.f32.mrf.mxu0 }
  0xc0   : > { %v332_v9 = vpack.c.bf16 %v328_v8, %v328_v8 }
  0xc2   : > { %v335_v10 = vunpack.c.l.b16 %v332_v9 }
  0xc4   : > { %v1299_v11 = vpack.c.b16 %v335_v10, %v335_v10 }
  0xc6   : > { %513 = vrot.lane.b32.xlu2 %v1299_v11, %s1120_s26  ;;  %395 = vrot.lane.b32.xlu1 %v1299_v11, %s1121_s7  ;;  %s754_s26 = sshll.u32 %s1282_s10, 2 }
  0xc7   : > { %337 = vrot.lane.b32.xlu0 %v1299_v11, %s1122_s23  ;;  %v330_v12 = vpop.f32.mrf.mxu0 }
  0xce   : > { %456 = vrot.lane.b32.xlu2 %v1299_v11, %s1123_s24  ;;  %515 = vrot.lane.b32.xlu1 %v1299_v11, %s1124_s27  ;;  %s626_s24 = scalar_lea.hbm %s1377_s5, %s766_s13  ;;  %s305_s27 = scalar_lea.vmem [#allocation11], %s754_s26 }
  0xcf   : > { %397 = vrot.lane.b32.xlu0 %v1299_v11, %s1125_s28  ;;  %s628_s28 = sshll.u32 %s305_s27, 4  ;;  %s629_s28 = int_to_ptr.vmem [resolvable:$true] %s628_s28 }
  0xd6   : > { %372 = vrot.lane.b32.xlu2 %v1299_v11, %s1126_s30  ;;  %s630_s30 = sshll.u32 %s626_s24, 4  ;;  %s631_s30 = int_to_ptr.hbm [resolvable:$true] %s630_s30 }
  0xd7   : > { %454 = vrot.lane.b32.xlu0 %v1299_v11, %s1127_s6  ;;  %s616_s6 = scalar_lea.sflag [#allocation4], %s1282_s10 }
  0xde   : > { %432 = vrot.lane.b32.xlu2 %v1299_v11, %s1128_s14  ;;  %s1052_s14 = sshra.s32 %s631_s30, 4  ;;  %s1053_s14 = int_to_ptr.hbm [resolvable:$true] %s1052_s14 }
  0xdf   : > { %p1059_p12 = scmp.lt.s32.totalorder %s1053_s14, %s1377_s5 }
 0x120   : > { %v514_v13 = vpop.permute.xlu2 %513 }
 0x128   : > { %v457_v14 = vpop.permute.xlu2 %456 }
 0x129   : > { %v462_v15 = vsel %vm339_vm1, %v457_v14, 0 }
 0x12a   : > { %471 = vmatpush.bf16.xpose.msrb.mxu0 %v462_v15 }
 0x130   : > { %v373_v16 = vpop.permute.xlu2 %372 }
 0x131   : > { %v379_v17 = vsel %vm377_vm2, %v373_v16, 0 }
 0x132   : > { %388 = vmatpush.bf16.msra.mxu2 %v379_v17 }
 0x138   : > { %v433_v18 = vpop.permute.xlu2 %432  ;;  %v396_v19 = vpop.permute.xlu1 %395 }
 0x139   : > { %v338_v20 = vpop.permute.xlu0 %337  ;;  %v438_v21 = vsel %vm377_vm2, %v433_v18, 0 }
 0x13a   : > { %v344_v22 = vsel %vm339_vm1, %v338_v20, 0  ;;  %447 = vmatpush.bf16.msrb.mxu2 %v438_v21 }
 0x13b   : > { %353 = vmatpush.bf16.xpose.msra.mxu1 %v344_v22 }
 0x140   : > { %v516_v23 = vpop.permute.xlu1 %515 }
 0x141   : > { %v398_v24 = vpop.permute.xlu0 %397  ;;  %v521_v25 = vsel %vm339_vm1, %v516_v23, 0 }
 0x142   : > { %756 = vmatmul.msk.bf16.vlgmr.msra.gmra.mxu1 %vm339_vm1, %v332_v9  ;;  %v403_v26 = vsel %vm339_vm1, %v398_v24, 0 }
 0x143   : > { %412 = vmatpush.bf16.xpose.msra.mxu3 %v403_v26 }
 0x149   : > { %v455_v27 = vpop.permute.xlu0 %454 }
 0x14a   : > { %758 = vmatmul.msk.bf16.vlgmr.msra.gmra.mxu3 %vm339_vm1, %v396_v19  ;;  %760 = vmatmul.msk.bf16.vlgmr.msrb.gmra.mxu0 %vm339_vm1, %v455_v27 }
 0x14b   : > { %530 = vmatpush.bf16.xpose.msrb.mxu3 %v521_v25 }
 0x15a   : > { %762 = vmatmul.msk.bf16.vlgmr.msrb.gmra.mxu3 %vm339_vm1, %v514_v13 }
 0x1bf   : > { %v355_v29 = vpop.f32.mrf.mxu1 }
 0x1c0   : > { %v356_v31 = vadd.f32 %v355_v29, %v333_v28 }
 0x1c2   : > { %v360_v32 = vadd.f32 %v359_v30, %v356_v31 }
 0x1c4   : > { %v361_v33 = vsel %vm339_vm1, %v360_v32, -inf }
 0x1c5   : > { %362 = vmax.xlane.f32.xlu1 %v361_v33 }
 0x1c7   : > { %v357_v34 = vpop.f32.mrf.mxu1  ;;  %v473_v35 = vpop.f32.mrf.mxu0 }
 0x1c8   : > { %v474_v37 = vadd.f32 %v473_v35, %v333_v28  ;;  %v592_v34 = vld [vmem:[#allocation7 + $0x10] sm:$0xff]  ;;  %v593_v35 = vld [vmem:[#allocation7 + $0x18] sm:$0xff] }
 0x1ca   : > { %v479_v38 = vadd.f32 %v478_v36, %v474_v37  ;;  %v595_v36 = vpack.c.bf16 %v593_v35, %v592_v34  ;;  %v590_v37 = vld [vmem:[#allocation7] sm:$0xff] }
 0x1cc   : > { %v480_v39 = vsel %vm339_vm1, %v479_v38, -inf  ;;  %605 = vmatpush.bf16.msra.mxu0 %v595_v36 }
 0x1cd   : > { %v414_v40 = vpop.f32.mrf.mxu3  ;;  %481 = vmax.xlane.f32.xlu1 %v480_v39 }
 0x1ce   : > { %v415_v42 = vadd.f32 %v414_v40, %v333_v28 }
 0x1cf   : > { %v475_v43 = vpop.f32.mrf.mxu0 }
 0x1d0   : > { %v420_v44 = vadd.f32 %v419_v41, %v415_v42 }
 0x1d2   : > { %v421_v45 = vsel %vm339_vm1, %v420_v44, -inf }
 0x1d3   : > { %422 = vmax.xlane.f32.xlu0 %v421_v45 }
 0x1d5   : > { %v416_v46 = vpop.f32.mrf.mxu3 }
 0x1dd   : > { %v532_v47 = vpop.f32.mrf.mxu3 }
 0x1de   : > { %v533_v49 = vadd.f32 %v532_v47, %v333_v28 }
 0x1e0   : > { %v538_v50 = vadd.f32 %v537_v48, %v533_v49 }
 0x1e2   : > { %v539_v51 = vsel %vm339_vm1, %v538_v50, -inf }
 0x1e3   : > { %540 = vmax.xlane.f32.xlu2 %v539_v51 }
 0x1e5   : > { %v534_v52 = vpop.f32.mrf.mxu3 }
 0x1e6   : > { %491 = vrot.lane.b32.xlu1 %v1299_v11, %s1129_s15  ;;  %s1054_s15 = scalar_lea.hbm %s1053_s14, 4 }
 0x1e7   : > { %550 = vrot.lane.b32.xlu0 %v1299_v11, %s1130_s16  ;;  %p1055_p1 = scmp.ne.s32.totalorder %s1053_s14, %s1054_s15 }
 0x1e9   : > { %p1056_p3 = pnand %p1055_p1, %p1251_p4 }
 0x1eb   : > { %p1057_p5 = pneg %p1056_p3 }
 0x238   : > { %v363_v53 = vpop.xlane.xlu1 %362 }
 0x239   : > { %v364_v54 = vsub.f32 %v360_v32, %v363_v53 }
 0x23b   : > { %v365_v55 = vmul.f32 1.442695, %v364_v54 }
 0x23d   : > { %872 = vpow2.f32 %v365_v55 }
 0x240   : > { %v482_v58 = vpop.xlane.xlu1 %481 }
 0x241   : > { %v483_v61 = vsub.f32 %v479_v38, %v482_v58  ;;  %v591_v38 = vld [vmem:[#allocation7 + $0x8] sm:$0xff] }
 0x242   : > { %v594_v39 = vpack.c.bf16 %v591_v38, %v590_v37 }
 0x243   : > { %v873_v56 = vpop.eup %872  ;;  %v484_v63 = vmul.f32 1.442695, %v483_v61 }
 0x244   : > { %v371_v57 = vpack.c.bf16 %v873_v56, %v873_v56  ;;  %v367_v15 = vsel %vm339_vm1, %v873_v56, 0.0  ;;  %606 = vmatpush.bf16.msra.mxu0 %v594_v39 }
 0x246   : > { %757 = vmatmul.msk.bf16.vlgmr.msra.gmra.mxu2 %vm339_vm1, %v371_v57  ;;  %v423_v59 = vpop.xlane.xlu0 %422 }
 0x247   : > { %v424_v60 = vsub.f32 %v420_v44, %v423_v59 }
 0x249   : > { %v425_v62 = vmul.f32 1.442695, %v424_v60 }
 0x24b   : > { %874 = vpow2.f32 %v425_v62 }
 0x24c   : > { %876 = vpow2.f32 %v484_v63 }
 0x251   : > { %v875_v0 = vpop.eup %874 }
 0x252   : > { %v427_v1 = vsel %vm339_vm1, %v875_v0, 0.0  ;;  %v431_v2 = vpack.c.bf16 %v875_v0, %v875_v0  ;;  %v877_v4 = vpop.eup %876 }
 0x253   : > { %428 = vadd.xlane.f32.xlu2 %v427_v1  ;;  %v486_v11 = vsel %vm339_vm1, %v877_v4, 0.0  ;;  %v490_v12 = vpack.c.bf16 %v877_v4, %v877_v4 }
 0x256   : > { %v541_v3 = vpop.xlane.xlu2 %540  ;;  %759 = vmatmul.msk.bf16.vlgmr.msrb.gmra.mxu2 %vm339_vm1, %v431_v2 }
 0x257   : > { %v542_v5 = vsub.f32 %v538_v50, %v541_v3 }
 0x258   : > { %v492_v6 = vpop.permute.xlu1 %491 }
 0x259   : > { %v543_v7 = vmul.f32 1.442695, %v542_v5  ;;  %v551_v8 = vpop.permute.xlu0 %550  ;;  %v497_v9 = vsel %vm377_vm2, %v492_v6, 0 }
 0x25a   : > { %v556_v10 = vsel %vm377_vm2, %v551_v8, 0  ;;  %506 = vmatpush.bf16.msrb.mxu1 %v497_v9 }
 0x25b   : > { %878 = vpow2.f32 %v543_v7  ;;  %565 = vmatpush.bf16.msra.mxu2 %v556_v10  ;;  %487 = vadd.xlane.f32.xlu2 %v486_v11 }
 0x25d   : > { %761 = vmatmul.msk.bf16.vlgmr.msrb.gmra.mxu1 %vm339_vm1, %v490_v12 }
 0x261   : > { %v879_v13 = vpop.eup %878 }
 0x262   : > { %v545_v14 = vsel %vm339_vm1, %v879_v13, 0.0  ;;  %v549_v16 = vpack.c.bf16 %v879_v13, %v879_v13 }
 0x263   : > { %546 = vadd.xlane.f32.xlu0 %v545_v14  ;;  %368 = vadd.xlane.f32.xlu2 %v367_v15 }
 0x266   : > { %763 = vmatmul.msk.bf16.vlgmr.msra.gmra.mxu2 %vm339_vm1, %v549_v16 }
 0x2c6   : > { %v429_v17 = vpop.xlane.xlu2 %428 }
 0x2c7   : > { %880 = vrcp.f32 %v429_v17 }
 0x2c9   : > { %v390_v18 = vpop.f32.mrf.mxu2 }
 0x2cd   : > { %v881_v21 = vpop.eup %880 }
 0x2ce   : > { %v488_v19 = vpop.xlane.xlu2 %487 }
 0x2cf   : > { %882 = vrcp.f32 %v488_v19 }
 0x2d1   : > { %v392_v20 = vpop.f32.mrf.mxu2 }
 0x2d5   : > { %v883_v23 = vpop.eup %882 }
 0x2d6   : > { %v547_v27 = vpop.xlane.xlu0 %546  ;;  %v369_v40 = vpop.xlane.xlu2 %368 }
 0x2d7   : > { %884 = vrcp.f32 %v547_v27 }
 0x2d8   : > { %886 = vrcp.f32 %v369_v40 }
 0x2d9   : > { %v449_v22 = vpop.f32.mrf.mxu2 }
 0x2da   : > { %v453_v24 = vmul.f32 %v881_v21, %v449_v22  ;;  %v508_v25 = vpop.f32.mrf.mxu1 }
 0x2db   : > { %v512_v26 = vmul.f32 %v883_v23, %v508_v25 }
 0x2dc   : > { %573 = vrot.lane.b32.xlu1 %v453_v24, %s1131_s9  ;;  %s1058_s9 = scalar_lea.hbm %s1377_s5, 8 }
 0x2dd   : > { %577 = vrot.lane.b32.xlu2 %v512_v26, %s1132_s17  ;;  %v885_v30 = vpop.eup %884  ;;  %p1060_p7 = scmp.lt.s32.totalorder %s1058_s9, %s1054_s15 }
 0x2de   : > { %v887_v41 = vpop.eup %886 }
 0x2df   : > { %v394_v43 = vmul.f32 %v887_v41, %v390_v18  ;;  %p1061_p8 = por %p1060_p7, %p1059_p12 }
 0x2e1   : > { %v451_v28 = vpop.f32.mrf.mxu2  ;;  %p1062_p9 = pnand %p1061_p8, %p1057_p5 }
 0x2e2   : > { %v510_v29 = vpop.f32.mrf.mxu1 }
 0x2e9   : > { %v567_v31 = vpop.f32.mrf.mxu2 }
 0x2ea   : > { %v571_v32 = vmul.f32 %v885_v30, %v567_v31 }
 0x2ec   : > { %581 = vrot.lane.b32.xlu1 %v571_v32, %s1133_s22 }
 0x2f1   : > { %v569_v33 = vpop.f32.mrf.mxu2 }
 0x337   : > { %v578_v45 = vpop.permute.xlu2 %577 }
 0x34e   : > { %v574_v42 = vpop.permute.xlu1 %573 }
 0x34f   : > { %v584_v44 = vsel %vm339_vm1, %v394_v43, %v574_v42 }
 0x350   : > { %v586_v46 = vsel %vm585_vm3, %v584_v44, %v578_v45 }
 0x35e   : > { %v582_v47 = vpop.permute.xlu1 %581 }
 0x35f   : > { %v588_v48 = vsel %vm587_vm4, %v586_v46, %v582_v47 }
 0x360   : > { %v589_v49 = vpack.c.bf16 %v588_v48, %v588_v48 }
 0x362   : > { %764 = vmatmul.msk.bf16.vlgmr.msra.gmra.mxu0 %vm315_vm0, %v589_v49 }
 0x3df   : > { %v608_v50 = vpop.f32.mrf.mxu0 }
 0x3e0   : > { %v612_v51 = vpack.c.bf16 %v608_v50, %v608_v50 }
 0x3e2   : > { %614 = vst.msk [vmem:[%s305_s27] sm:$0xf] %vm613_vm5, %v612_v51 }
 0x3e3   : > { %1065 = shalt.err (!%p1062_p9)
}
 0x3e4   : > { %787 = dma.vmem_to_hbm [thread:$0]  (%p1251_p4), %s629_s28, 64, %s631_s30, %s616_s6  }
 0x3e7   : > { %v610_v52 = vpop.f32.mrf.mxu0 }
 0x3e8 PF: > { %s642_s10 = sand.u32 1, %s1100_s18   ;;  %p1385_p10 = scmp.ge.s32.totalorder %s1112_s21, 2 }
 0x3e9   : > { %s643_s13 = scalar_lea.sflag [#allocation4], %s642_s10 }
 0x3ea   : > { %p807_p13 = pnand %p1385_p10, %p1255_p6 }
 0x3ec   : > { %p808_p11 = pneg %p807_p13 }
 0x3ee   : > { %1095 = dma.done.wait (%p808_p11), %s643_s13, 64  }
 0x3ef   : > { %1097 = vsyncadd (%p808_p11), %s643_s13, 4294967232  ;;  %p20_p0 = scmp.ge.s32.totalorder %s1225_s29, 4   ;;  %s1386_s18 = smov %s1104_s19 }
 0x3f0   : > { %s1387_s19 = smov %s1108_s20  ;;  %s1388_s20 = smov %s1236_s8 }
 0x3f1   : > { %s1389_s21 = smov %s1225_s29  ;;  %22 = sbr.rel (!%p20_p0) target bundleno = 7 (0x7), region = 104 }
 0x3f6   :  { %649 = vsyncpa [#allocation3], 1 }
 0x3f7   :  { %651 = vsyncpa [#allocation3 + $0x1], 1 }
 0x3f8   :  { %652 = vsyncpa [#allocation6], 1 }
 0x3f9   :  { %653 = vsyncpa [#allocation9], 1 }
 0x3fa   :  { %654 = vsyncpa [#allocation4], 1 }
 0x3fb   :  { %656 = vsyncpa [#allocation4 + $0x1], 1 }

</bundles_post_ra>
